<compile_context>
chip_gen: v5e
topology: v5e:2x2
jax: 0.10.0
libtpu: 0.0.40
codegen_flags: <defaults>
</compile_context>

<pallas_src>
import jax
import jax.numpy as jnp
from jax import lax
from jax.experimental import pallas as pl
from jax.experimental.pallas import tpu as pltpu

INPUT_SIZE = 8
HIDDEN_SIZE = 50
OUTPUT_SIZE = 2
HIDDEN_PAD = 64  # 50 zero-padded up to a clean sublane multiple


def _round_up(x, m):
    return (x + m - 1) // m * m


def _mlp_kernel(x_ref, w1_ref, b1_ref, w2t_ref, b2t_ref, ot_ref):
    # fc1: x @ W1 + b1, ReLU  (f32 accumulation on the MXU)
    x = x_ref[...]
    h = jnp.dot(x, w1_ref[...], preferred_element_type=jnp.float32) + b1_ref[...]
    h = jnp.maximum(h, 0.0)
    # fc2 computed directly in the transposed frame: o^T = W2^T @ h^T, expressed
    # as dot_general(w2t (O, Hp), h (tb, Hp)) contracting the hidden dim.
    # Result (O, tb) is lane-dense (tb multiple of 128) -> unmasked-ish stores,
    # and no XLU transpose is needed.
    ot = lax.dot_general(
        w2t_ref[...], h.astype(w2t_ref.dtype),
        dimension_numbers=(((1,), (1,)), ((), ())),
        preferred_element_type=jnp.float32)
    ot_ref[...] = (ot + b2t_ref[...]).astype(ot_ref.dtype)


def traffic_model_forward(x, w1, b1, w2, b2, *, tile_b=1024,
                          compute_dtype=jnp.float32):
    """x: [B, 8]. w1: [8, 50], b1: [1, 50] or [50], w2: [50, 2], b2: [1, 2] or [2].

    Returns [B, 2] float32. Pass compute_dtype=jnp.bfloat16 on v6e/v7x to halve
    HBM read traffic (accumulation stays float32).
    """
    B = x.shape[0]
    b1 = jnp.asarray(b1, jnp.float32).reshape(1, HIDDEN_SIZE)
    b2t = jnp.asarray(b2, jnp.float32).reshape(OUTPUT_SIZE, 1)

    # Zero-pad hidden dim 50 -> 64 (numerically identical, pads are zero).
    w1p = jnp.zeros((INPUT_SIZE, HIDDEN_PAD), compute_dtype)
    w1p = w1p.at[:, :HIDDEN_SIZE].set(w1.astype(compute_dtype))
    b1p = jnp.zeros((1, HIDDEN_PAD), jnp.float32).at[:, :HIDDEN_SIZE].set(b1)
    # Store fc2 weights pre-transposed (OUTPUT_SIZE, HIDDEN_PAD) for the
    # transposed-frame matmul.
    w2tp = jnp.zeros((OUTPUT_SIZE, HIDDEN_PAD), compute_dtype)
    w2tp = w2tp.at[:, :HIDDEN_SIZE].set(w2.astype(compute_dtype).T)

    # Batch tiling: tile must be a multiple of 128 (lane dim of the transposed
    # output) and of 8 (sublane dim of the x tile). Pad B up to a multiple.
    tile_b = _round_up(max(tile_b, 128), 128)
    tb = min(tile_b, _round_up(max(B, 1), 128))
    Bp = _round_up(B, tb)

    xp = x.astype(compute_dtype)
    if Bp != B:
        xp = jnp.pad(xp, ((0, Bp - B), (0, 0)))

    itemsize = jnp.dtype(compute_dtype).itemsize
    cost = pl.CostEstimate(
        flops=2 * Bp * (INPUT_SIZE * HIDDEN_PAD + HIDDEN_PAD * OUTPUT_SIZE),
        transcendentals=0,
        bytes_accessed=(Bp * INPUT_SIZE * itemsize            # x read
                        + Bp * OUTPUT_SIZE * 4                # out write
                        + (INPUT_SIZE + OUTPUT_SIZE) * HIDDEN_PAD * itemsize
                        + (HIDDEN_PAD + OUTPUT_SIZE) * 4))    # weights + biases

    grid = (Bp // tb,)
    out_t = pl.pallas_call(
        _mlp_kernel,
        out_shape=jax.ShapeDtypeStruct((OUTPUT_SIZE, Bp), jnp.float32),
        grid=grid,
        in_specs=[
            pl.BlockSpec((tb, INPUT_SIZE), lambda i: (i, 0)),            # x tile
            pl.BlockSpec((INPUT_SIZE, HIDDEN_PAD), lambda i: (0, 0)),    # w1 (resident)
            pl.BlockSpec((1, HIDDEN_PAD), lambda i: (0, 0)),             # b1 (resident)
            pl.BlockSpec((OUTPUT_SIZE, HIDDEN_PAD), lambda i: (0, 0)),   # w2^T (resident)
            pl.BlockSpec((OUTPUT_SIZE, 1), lambda i: (0, 0)),            # b2^T (resident)
        ],
        out_specs=pl.BlockSpec((OUTPUT_SIZE, tb), lambda i: (0, i)),
        compiler_params=pltpu.CompilerParams(
            # batch tiles are independent -> shard across TCs on v7x megacore
            dimension_semantics=("parallel",),
        ),
        cost_estimate=cost,
    )(xp, w1p, b1p, w2tp, b2t)

    return out_t.T[:B]


def init_params(key):
    """Deterministic init mimicking nn.Linear default (uniform +- 1/sqrt(fan_in)).
    Weights stored pre-transposed as [in_features, out_features]."""
    k1, k2, k3, k4 = jax.random.split(key, 4)
    bound1 = 1.0 / jnp.sqrt(INPUT_SIZE)
    bound2 = 1.0 / jnp.sqrt(HIDDEN_SIZE)
    w1 = jax.random.uniform(k1, (INPUT_SIZE, HIDDEN_SIZE), jnp.float32, -bound1, bound1)
    b1 = jax.random.uniform(k2, (1, HIDDEN_SIZE), jnp.float32, -bound1, bound1)
    w2 = jax.random.uniform(k3, (HIDDEN_SIZE, OUTPUT_SIZE), jnp.float32, -bound2, bound2)
    b2 = jax.random.uniform(k4, (1, OUTPUT_SIZE), jnp.float32, -bound2, bound2)
    return w1, b1, w2, b2


def reference_forward(x, w1, b1, w2, b2):
    h = jnp.maximum(x @ w1 + b1, 0.0)
    return h @ w2 + b2


if __name__ == "__main__":
    key = jax.random.PRNGKey(0)
    kx1, kx2, kp = jax.random.split(key, 3)
    w1, b1, w2, b2 = init_params(kp)

    # Small batch (single grid step, padded batch tile).
    batch = 8
    x = jax.random.normal(kx1, (batch, INPUT_SIZE), jnp.float32)
    out = jax.block_until_ready(traffic_model_forward(x, w1, b1, w2, b2))
    ref = reference_forward(x, w1, b1, w2, b2)
    assert out.shape == (batch, OUTPUT_SIZE), out.shape
    assert jnp.allclose(out, ref, atol=1e-5, rtol=1e-5), "mismatch vs reference (B=8)"

    # Non-multiple batch exercising the multi-step tiled grid + batch padding.
    batch2 = 300
    x2 = jax.random.normal(kx2, (batch2, INPUT_SIZE), jnp.float32)
    out2 = jax.block_until_ready(
        traffic_model_forward(x2, w1, b1, w2, b2, tile_b=128))
    ref2 = reference_forward(x2, w1, b1, w2, b2)
    assert out2.shape == (batch2, OUTPUT_SIZE), out2.shape
    assert jnp.allclose(out2, ref2, atol=1e-5, rtol=1e-5), "mismatch vs reference (B=300)"

    print("KERNEL_OK")
</pallas_src>

<mosaic_0001>
module attributes {stable_mosaic.version = 11 : i64} {
  func.func @_mlp_kernel(%arg0: i32, %arg1: memref<128x8xf32, #tpu.memory_space<vmem>>, %arg2: memref<8x64xf32, #tpu.memory_space<vmem>>, %arg3: memref<1x64xf32, #tpu.memory_space<vmem>>, %arg4: memref<2x64xf32, #tpu.memory_space<vmem>>, %arg5: memref<2x1xf32, #tpu.memory_space<vmem>>, %arg6: memref<2x128xf32, #tpu.memory_space<vmem>>) attributes {dimension_semantics = [#tpu.dimension_semantics<parallel>], iteration_bounds = array<i64: 1>, scalar_prefetch = 0 : i64, scratch_operands = 0 : i64, tpu.core_type = #tpu.core_type<tc>, window_params = [{transform_indices = @transform_0, window_bounds = array<i64: 128, 8>}, {pipeline_mode = #tpu.pipeline_mode<synchronous>, transform_indices = @transform_1, window_bounds = array<i64: 8, 64>}, {pipeline_mode = #tpu.pipeline_mode<synchronous>, transform_indices = @transform_2, window_bounds = array<i64: 1, 64>}, {pipeline_mode = #tpu.pipeline_mode<synchronous>, transform_indices = @transform_3, window_bounds = array<i64: 2, 64>}, {pipeline_mode = #tpu.pipeline_mode<synchronous>, transform_indices = @transform_4, window_bounds = array<i64: 2, 1>}, {transform_indices = @transform_5, window_bounds = array<i64: 2, 128>}]} {
    %c0 = arith.constant 0 : index
    %c0_0 = arith.constant 0 : index
    %0 = vector.load %arg1[%c0, %c0_0] : memref<128x8xf32, #tpu.memory_space<vmem>>, vector<128x8xf32>
    %c0_1 = arith.constant 0 : index
    %c0_2 = arith.constant 0 : index
    %1 = vector.load %arg2[%c0_1, %c0_2] : memref<8x64xf32, #tpu.memory_space<vmem>>, vector<8x64xf32>
    %cst = arith.constant dense<0.000000e+00> : vector<128x64xf32>
    %2 = tpu.matmul %0, %1, %cst {dimension_numbers = #tpu.dot_dimension_numbers<[1], [0], [0], [1], [0, 0, 1, 1], [], []>} : vector<128x8xf32>, vector<8x64xf32>, vector<128x64xf32> -> vector<128x64xf32>
    %c0_3 = arith.constant 0 : index
    %c0_4 = arith.constant 0 : index
    %3 = vector.load %arg3[%c0_3, %c0_4] : memref<1x64xf32, #tpu.memory_space<vmem>>, vector<1x64xf32>
    %4 = vector.broadcast %3 : vector<1x64xf32> to vector<128x64xf32>
    %5 = arith.addf %2, %4 : vector<128x64xf32>
    %cst_5 = arith.constant 0.000000e+00 : f32
    %6 = vector.broadcast %cst_5 : f32 to vector<128x64xf32>
    %7 = arith.maximumf %5, %6 : vector<128x64xf32>
    %c0_6 = arith.constant 0 : index
    %c0_7 = arith.constant 0 : index
    %8 = vector.load %arg4[%c0_6, %c0_7] : memref<2x64xf32, #tpu.memory_space<vmem>>, vector<2x64xf32>
    %cst_8 = arith.constant dense<0.000000e+00> : vector<2x128xf32>
    %9 = tpu.matmul %8, %7, %cst_8 {dimension_numbers = #tpu.dot_dimension_numbers<[1], [1], [0], [0], [0, 0, 1, 0], [], []>} : vector<2x64xf32>, vector<128x64xf32>, vector<2x128xf32> -> vector<2x128xf32>
    %c0_9 = arith.constant 0 : index
    %c0_10 = arith.constant 0 : index
    %10 = vector.load %arg5[%c0_9, %c0_10] : memref<2x1xf32, #tpu.memory_space<vmem>>, vector<2x1xf32>
    %11 = vector.broadcast %10 : vector<2x1xf32> to vector<2x128xf32>
    %12 = arith.addf %9, %11 : vector<2x128xf32>
    %c0_11 = arith.constant 0 : index
    %c0_12 = arith.constant 0 : index
    %13 = vector.load %arg6[%c0_11, %c0_12] : memref<2x128xf32, #tpu.memory_space<vmem>>, vector<2x128xf32>
    tpu.vector_store %arg6[%c0_11, %c0_12], %12 {strides = array<i32>} : memref<2x128xf32, #tpu.memory_space<vmem>>, vector<2x128xf32>,
    return
  }
  func.func @transform_0(%arg0: i32) -> (i32, i32) {
    %c0_i32 = arith.constant 0 : i32
    %c0_i32_0 = arith.constant 0 : i32
    return %arg0, %c0_i32 : i32, i32
  }
  func.func @transform_1(%arg0: i32) -> (i32, i32) {
    %c0_i32 = arith.constant 0 : i32
    %c0_i32_0 = arith.constant 0 : i32
    %c0_i32_1 = arith.constant 0 : i32
    return %c0_i32, %c0_i32_0 : i32, i32
  }
  func.func @transform_2(%arg0: i32) -> (i32, i32) {
    %c0_i32 = arith.constant 0 : i32
    %c0_i32_0 = arith.constant 0 : i32
    %c0_i32_1 = arith.constant 0 : i32
    return %c0_i32, %c0_i32_0 : i32, i32
  }
  func.func @transform_3(%arg0: i32) -> (i32, i32) {
    %c0_i32 = arith.constant 0 : i32
    %c0_i32_0 = arith.constant 0 : i32
    %c0_i32_1 = arith.constant 0 : i32
    return %c0_i32, %c0_i32_0 : i32, i32
  }
  func.func @transform_4(%arg0: i32) -> (i32, i32) {
    %c0_i32 = arith.constant 0 : i32
    %c0_i32_0 = arith.constant 0 : i32
    %c0_i32_1 = arith.constant 0 : i32
    return %c0_i32, %c0_i32_0 : i32, i32
  }
  func.func @transform_5(%arg0: i32) -> (i32, i32) {
    %c0_i32 = arith.constant 0 : i32
    %c0_i32_0 = arith.constant 0 : i32
    return %c0_i32, %arg0 : i32, i32
  }
}

</mosaic_0001>

<bundles_post_ra>
// kernel: tpu_custom_call.1
= control target key start
LH: loop header
LB: loop body
LE: loop exit
PB: predicated region body
PF: predicated region fallthrough
CT: control target
= control target key end

     0   :  { %vm42_vm0 = vcmask 64512   ;;  %s482_s0 = inlined_call_operand.vmem [shape: f32[128,8], index: 0, kind: input, shape index: {}]   ;;  %s483_s1 = inlined_call_operand.vmem [shape: f32[8,64], index: 1, kind: input, shape index: {}]   ;;  %s484_s2 = inlined_call_operand.vmem [shape: f32[1,64], index: 2, kind: input, shape index: {}]   ;;  %s485_s3 = inlined_call_operand.vmem [shape: f32[2,64], index: 3, kind: input, shape index: {}]   ;;  %s486_s4 = inlined_call_operand.vmem [shape: f32[2,1], index: 4, kind: input, shape index: {}]   ;;  %s487_s5 = inlined_call_operand.hbm [shape: f32[2,128], index: 5, kind: output, shape index: {}]  }
   0x1   :  { %v37_v0 = vld [vmem:[%s483_s1] sm:$0xff]  ;;  %v28_v1 = vld [vmem:[%s482_s0 + $0x38] sm:$0xff]  ;;  %v35_v2 = vld [vmem:[%s482_s0 + $0x70] sm:$0xff] }
   0x2   :  { %301 = vmatpush.msra.mxu2 %v37_v0  ;;  %302 = vmatpush.msra.mxu3 %v37_v0  ;;  %v21_v3 = vld [vmem:[%s482_s0] sm:$0xff] }
   0x3   :  { %275 = vmatmul.msk.f32.vlgmr.msra.gmra.mxu2 %vm42_vm0, %v28_v1  ;;  %282 = vmatmul.msk.f32.vlgmr.msra.gmra.mxu3 %vm42_vm0, %v35_v2 }
   0x4   :  { %106 = vmatpush.msra.mxu0 %v37_v0 }
   0x5   :  { %10 = vsyncpa [#allocation3], 0  ;;  %268 = vmatmul.msk.f32.vlgmr.msra.gmra.mxu0 %vm42_vm0, %v21_v3  ;;  %v29_v4 = vld [vmem:[%s482_s0 + $0x40] sm:$0xff]  ;;  %v36_v5 = vld [vmem:[%s482_s0 + $0x78] sm:$0xff]  ;;  %vm179_vm1 = vcmask 523264   ;;  %v333_v56 = vmov 0  }
   0x6   :  { %v22_v6 = vld [vmem:[%s482_s0 + $0x8] sm:$0xff]  ;;  %v23_v8 = vld [vmem:[%s482_s0 + $0x10] sm:$0xff]  ;;  %v24_v10 = vld [vmem:[%s482_s0 + $0x18] sm:$0xff]  ;;  %305 = vset.pattern.permute.xlu0 %v333_v56  ;;  %s334_s28 = smov [#allocation2]   ;;  %s259_s7 = sshll.u32 %s487_s5, 4  ;;  %s260_s7 = int_to_ptr.hbm [resolvable:$true] %s259_s7 }
   0x7   :  { %v30_v7 = vld [vmem:[%s482_s0 + $0x48] sm:$0xff]  ;;  %v31_v9 = vld [vmem:[%s482_s0 + $0x50] sm:$0xff]  ;;  %v32_v11 = vld [vmem:[%s482_s0 + $0x58] sm:$0xff]  ;;  %s257_s29 = sshll.u32 %s334_s28, 4  ;;  %s258_s29 = int_to_ptr.vmem [resolvable:$true] %s257_s29 }
   0x8   :  { %v25_v12 = vld [vmem:[%s482_s0 + $0x20] sm:$0xff]  ;;  %v26_v14 = vld [vmem:[%s482_s0 + $0x28] sm:$0xff]  ;;  %v27_v16 = vld [vmem:[%s482_s0 + $0x30] sm:$0xff] }
   0x9   :  { %v33_v13 = vld [vmem:[%s482_s0 + $0x60] sm:$0xff]  ;;  %v34_v15 = vld [vmem:[%s482_s0 + $0x68] sm:$0xff] }
   0xa   :  { %v435_v17 = vld [vmem:[%s484_s2] ss:$0 sm:$0xff] }
   0xb   :  { %276 = vmatmul.msk.f32.gmra.mxu2 %vm42_vm0, %v29_v4  ;;  %283 = vmatmul.msk.f32.gmra.mxu3 %vm42_vm0, %v36_v5  ;;  %v173_v54 = vld [vmem:[%s486_s4] sm:$0x3] }
   0xc   :  { %176 = vperm.xlu0 %305, %v173_v54   ;;  %v172_v4 = vld [vmem:[%s485_s3] sm:$0x3] }
   0xd   :  { %269 = vmatmul.msk.f32.gmra.mxu0 %vm42_vm0, %v22_v6 }
  0x13   :  { %277 = vmatmul.msk.f32.gmra.mxu2 %vm42_vm0, %v30_v7 }
  0x15   :  { %270 = vmatmul.msk.f32.gmra.mxu0 %vm42_vm0, %v23_v8 }
  0x1b   :  { %278 = vmatmul.msk.f32.gmra.mxu2 %vm42_vm0, %v31_v9 }
  0x1d   :  { %271 = vmatmul.msk.f32.gmra.mxu0 %vm42_vm0, %v24_v10 }
  0x23   :  { %279 = vmatmul.msk.f32.gmra.mxu2 %vm42_vm0, %v32_v11 }
  0x25   :  { %272 = vmatmul.msk.f32.gmra.mxu0 %vm42_vm0, %v25_v12 }
  0x2b   :  { %280 = vmatmul.msk.f32.gmra.mxu2 %vm42_vm0, %v33_v13 }
  0x2d   :  { %273 = vmatmul.msk.f32.gmra.mxu0 %vm42_vm0, %v26_v14 }
  0x33   :  { %281 = vmatmul.msk.f32.gmra.mxu2 %vm42_vm0, %v34_v15 }
  0x35   :  { %274 = vmatmul.msk.f32.gmra.mxu0 %vm42_vm0, %v27_v16 }
  0x7e   :  { %v177_v5 = vpop.permute.xlu0 %176 }
  0x82   :  { %v108_v18 = vpop.f32.mrf.mxu0 }
  0x83   :  { %v438_v19 = vadd.f32 %v435_v17, %v108_v18 }
  0x85   :  { %v156_v3 = vmax.f32 %v438_v19, 0.0 }
  0x86   :  { %v129_v20 = vpop.f32.mrf.mxu2  ;;  %v150_v21 = vpop.f32.mrf.mxu3 }
  0x87   :  { %v130_v22 = vadd.f32 %v435_v17, %v129_v20  ;;  %v151_v25 = vadd.f32 %v435_v17, %v150_v21 }
  0x89   :  { %v170_v28 = vmax.f32 %v151_v25, 0.0  ;;  %v163_v53 = vmax.f32 %v130_v22, 0.0 }
  0x8a   :  { %v111_v30 = vpop.f32.mrf.mxu0 }
  0x8b   :  { %v112_v0 = vadd.f32 %v435_v17, %v111_v30 }
  0x8d   :  { %v157_v2 = vmax.f32 %v112_v0, 0.0 }
  0x8e   :  { %v132_v23 = vpop.f32.mrf.mxu2  ;;  %v153_v24 = vpop.f32.mrf.mxu3 }
  0x8f   :  { %v154_v26 = vadd.f32 %v435_v17, %v153_v24  ;;  %v133_v48 = vadd.f32 %v435_v17, %v132_v23 }
  0x91   :  { %v171_v27 = vmax.f32 %v154_v26, 0.0  ;;  %v164_v51 = vmax.f32 %v133_v48, 0.0 }
  0x92   :  { %v114_v32 = vpop.f32.mrf.mxu0 }
  0x93   :  { %284 = vmatpush.xpose.msk.msra.mxu1 %vm179_vm1, %v171_v27  ;;  %v115_v62 = vadd.f32 %v435_v17, %v114_v32 }
  0x95   :  { %v158_v1 = vmax.f32 %v115_v62, 0.0 }
  0x96   :  { %v135_v29 = vpop.f32.mrf.mxu2 }
  0x97   :  { %285 = vmatpush.xpose.msk.msra.mxu1 %vm179_vm1, %v170_v28  ;;  %v136_v46 = vadd.f32 %v435_v17, %v135_v29 }
  0x99   :  { %v165_v49 = vmax.f32 %v136_v46, 0.0 }
  0x9a   :  { %v117_v35 = vpop.f32.mrf.mxu0 }
  0x9b   :  { %v118_v60 = vadd.f32 %v435_v17, %v117_v35 }
  0x9d   :  { %v159_v63 = vmax.f32 %v118_v60, 0.0 }
  0x9e   :  { %v138_v31 = vpop.f32.mrf.mxu2 }
  0x9f   :  { %v139_v43 = vadd.f32 %v435_v17, %v138_v31 }
  0xa1   :  { %v166_v47 = vmax.f32 %v139_v43, 0.0 }
  0xa2   :  { %v120_v38 = vpop.f32.mrf.mxu0 }
  0xa3   :  { %v121_v58 = vadd.f32 %v435_v17, %v120_v38 }
  0xa5   :  { %v160_v61 = vmax.f32 %v121_v58, 0.0 }
  0xa6   :  { %v141_v33 = vpop.f32.mrf.mxu2 }
  0xa7   :  { %v142_v41 = vadd.f32 %v435_v17, %v141_v33 }
  0xa9   :  { %v167_v44 = vmax.f32 %v142_v41, 0.0 }
  0xaa   :  { %v123_v45 = vpop.f32.mrf.mxu0 }
  0xab   :  { %v124_v57 = vadd.f32 %v435_v17, %v123_v45 }
  0xad   :  { %v161_v59 = vmax.f32 %v124_v57, 0.0 }
  0xae   :  { %v144_v34 = vpop.f32.mrf.mxu2 }
  0xaf   :  { %v145_v39 = vadd.f32 %v435_v17, %v144_v34 }
  0xb1   :  { %v168_v42 = vmax.f32 %v145_v39, 0.0 }
  0xb2   :  { %v126_v50 = vpop.f32.mrf.mxu0 }
  0xb3   :  { %v127_v52 = vadd.f32 %v435_v17, %v126_v50 }
  0xb5   :  { %v162_v55 = vmax.f32 %v127_v52, 0.0 }
  0xb6   :  { %v147_v36 = vpop.f32.mrf.mxu2 }
  0xb7   :  { %v148_v37 = vadd.f32 %v435_v17, %v147_v36 }
  0xb9   :  { %v169_v40 = vmax.f32 %v148_v37, 0.0 }
  0xbb   :  { %286 = vmatpush.xpose.msk.msra.mxu1 %vm179_vm1, %v169_v40 }
  0xbf   :  { %287 = vmatpush.xpose.msk.msra.mxu1 %vm179_vm1, %v168_v42 }
  0xc3   :  { %288 = vmatpush.xpose.msk.msra.mxu1 %vm179_vm1, %v167_v44 }
  0xc7   :  { %289 = vmatpush.xpose.msk.msra.mxu1 %vm179_vm1, %v166_v47 }
  0xcb   :  { %290 = vmatpush.xpose.msk.msra.mxu1 %vm179_vm1, %v165_v49 }
  0xcf   :  { %291 = vmatpush.xpose.msk.msra.mxu1 %vm179_vm1, %v164_v51 }
  0xd3   :  { %292 = vmatpush.xpose.msk.msra.mxu1 %vm179_vm1, %v163_v53 }
  0xd7   :  { %293 = vmatpush.xpose.msk.msra.mxu1 %vm179_vm1, %v162_v55 }
  0xdb   :  { %294 = vmatpush.xpose.msk.msra.mxu1 %vm179_vm1, %v161_v59 }
  0xdf   :  { %295 = vmatpush.xpose.msk.msra.mxu1 %vm179_vm1, %v160_v61 }
  0xe3   :  { %296 = vmatpush.xpose.msk.msra.mxu1 %vm179_vm1, %v159_v63 }
  0xe7   :  { %297 = vmatpush.xpose.msk.msra.mxu1 %vm179_vm1, %v158_v1 }
  0xeb   :  { %298 = vmatpush.xpose.msk.msra.mxu1 %vm179_vm1, %v157_v2 }
  0xef   :  { %299 = vmatpush.xpose.msk.msra.mxu1 %vm179_vm1, %v156_v3 }
  0xf2   :  { %300 = vmatmul.msk.f32.vlgmr.msra.gmra.mxu1 %vm179_vm1, %v172_v4 }
 0x16f   :  { %v248_v6 = vpop.f32.mrf.mxu1 }
 0x170   :  { %v249_v7 = vadd.f32 %v248_v6, %v177_v5 }
 0x172   :  { %251 = vst [vmem:[#allocation2] sm:$0x3] %v249_v7 }
 0x173   :  { %262 = dma.vmem_to_hbm [thread:$0]  %s258_s29, 32, %s260_s7, [#allocation3]  }
 0x174   :  { %331 = dma.done.wait [#allocation3], 32  }
 0x175   :  { %332 = vsyncadd [#allocation3], 4294967264 }
 0x176   :  { %267 = vsyncpa [#allocation3], 1 }

</bundles_post_ra>
